<compile_context>
chip_gen: v6e
topology: v6e:2x2x1
jax: 0.10.0
libtpu: 0.0.40
codegen_flags: <defaults>
</compile_context>

<pallas_src>
from functools import partial

import jax
import jax.numpy as jnp
from jax.experimental import pallas as pl
from jax.experimental.pallas import tpu as pltpu


# --------------------------------------------------------------- kernels ----

def _drop_path_kernel(scale_ref, x_ref, o_ref, *, cdt):
    # scale_ref: VMEM (bm, 1) f32 ; x_ref / o_ref: VMEM (bm, bf)
    s = scale_ref[...].astype(cdt)
    o_ref[...] = (x_ref[...].astype(cdt) * s).astype(o_ref.dtype)


def _residual_drop_path_kernel(scale_ref, x_ref, y_ref, o_ref, *, cdt):
    # Fused residual form used inside a ViT Block:  o = x + scale_b * y
    s = scale_ref[...].astype(cdt)
    o_ref[...] = (x_ref[...].astype(cdt)
                  + y_ref[...].astype(cdt) * s).astype(o_ref.dtype)


# --------------------------------------------------------------- helpers ----

_TARGET_BLOCK_BYTES = 2 * 1024 * 1024   # ~2 MiB per stream block (mem-bound sweet spot)
_MIN_GRID_STEPS = 8                      # enough blocks to pipeline + split across TCs
_MAX_BM = 64                             # rows per block when B is large


def _sublane_multiple(itemsize):
    return {4: 8, 2: 16, 1: 32}.get(int(itemsize), 8)


def _is_v5e():
    try:
        kind = getattr(jax.devices()[0], "device_kind", "").lower()
        return ("v5e" in kind) or ("v5 lite" in kind) or ("v5litepod" in kind)
    except Exception:
        return False


def _compute_dtype(x_dtype):
    # bf16 VPU exists on v6e/v7x; v5e must compute in f32.
    if jnp.dtype(x_dtype) == jnp.bfloat16 and not _is_v5e():
        return jnp.bfloat16
    return jnp.float32


def _choose_blocks(batch, feat, itemsize):
    """Pick (bm, bf): sublane-aligned rows, 128-aligned lane-dense feat blocks."""
    sub = _sublane_multiple(itemsize)
    if batch <= _MAX_BM:
        bm = batch                       # block dim == full dim: always legal
    else:
        bm = max(sub, (_MAX_BM // sub) * sub)

    if feat % 128 != 0:
        bf = feat                        # must equal full dim if not 128-aligned
    else:
        target_elems = max(128, _TARGET_BLOCK_BYTES // (itemsize * max(bm, 1)))
        bf = max(128, min(feat, (target_elems // 128) * 128))
        # Ensure enough total grid steps for pipelining / megacore, data permitting.
        while bf > 128 and pl.cdiv(batch, bm) * pl.cdiv(feat, bf) < _MIN_GRID_STEPS:
            bf = max(128, ((bf // 2) // 128) * 128)
    return bm, bf


def _vmem_limit(bm, bf, itemsize, n_streams):
    # double-buffered big streams + slack; stay well under v7x's 64 MiB physical.
    need = 2 * n_streams * bm * bf * itemsize + (2 << 20)
    return int(min(max(need, 16 << 20), 40 << 20))


def _per_sample_scale(key, batch, keep_prob):
    # floor(keep_prob + U[0,1)) in {0,1}; fold the 1/keep_prob into the mask.
    u = jax.random.uniform(key, (batch,), dtype=jnp.float32)
    mask = jnp.floor(keep_prob + u)
    return (mask / keep_prob).reshape(batch, 1)  # (B, 1) f32


# -------------------------------------------------------------- wrappers ----

def drop_path(x, drop_prob: float = 0.0, training: bool = False, key=None):
    """JAX/Pallas equivalent of torch drop_path (per-sample stochastic depth)."""
    if drop_prob == 0.0 or not training:
        return x
    assert key is not None, "need a PRNG key in training mode"

    keep_prob = 1.0 - drop_prob
    orig_shape = x.shape
    B = orig_shape[0]
    feat = 1
    for d in orig_shape[1:]:
        feat *= d

    scale = _per_sample_scale(key, B, keep_prob)
    x2d = x.reshape(B, feat)  # metadata-only reshape; no pad, no post-slice

    itemsize = jnp.dtype(x.dtype).itemsize
    bm, bf = _choose_blocks(B, feat, itemsize)
    grid = (pl.cdiv(B, bm), pl.cdiv(feat, bf))
    cdt = _compute_dtype(x.dtype)

    out = pl.pallas_call(
        partial(_drop_path_kernel, cdt=cdt),
        out_shape=jax.ShapeDtypeStruct((B, feat), x.dtype),
        grid=grid,
        in_specs=[
            pl.BlockSpec((bm, 1), lambda i, j: (i, 0)),   # per-sample scale
            pl.BlockSpec((bm, bf), lambda i, j: (i, j)),  # x tile (lane-dense)
        ],
        out_specs=pl.BlockSpec((bm, bf), lambda i, j: (i, j)),
        compiler_params=pltpu.CompilerParams(
            dimension_semantics=("parallel", "parallel"),
            vmem_limit_bytes=_vmem_limit(bm, bf, itemsize, n_streams=2),
        ),
    )(scale, x2d)

    return out.reshape(orig_shape)


def residual_add_drop_path(x, branch, drop_prob: float = 0.0,
                           training: bool = False, key=None):
    """Fused `x + drop_path(branch)` — the exact form used in ViT Block residuals."""
    if drop_prob == 0.0 or not training:
        # Identity drop path: plain jnp add so XLA can fuse it with neighbours.
        return x + branch
    assert key is not None, "need a PRNG key in training mode"

    orig_shape = x.shape
    B = orig_shape[0]
    feat = 1
    for d in orig_shape[1:]:
        feat *= d

    scale = _per_sample_scale(key, B, 1.0 - drop_prob)
    x2d = x.reshape(B, feat)
    y2d = branch.reshape(B, feat)

    itemsize = jnp.dtype(x.dtype).itemsize
    bm, bf = _choose_blocks(B, feat, itemsize)
    grid = (pl.cdiv(B, bm), pl.cdiv(feat, bf))
    cdt = _compute_dtype(x.dtype)

    out = pl.pallas_call(
        partial(_residual_drop_path_kernel, cdt=cdt),
        out_shape=jax.ShapeDtypeStruct((B, feat), x.dtype),
        grid=grid,
        in_specs=[
            pl.BlockSpec((bm, 1), lambda i, j: (i, 0)),
            pl.BlockSpec((bm, bf), lambda i, j: (i, j)),
            pl.BlockSpec((bm, bf), lambda i, j: (i, j)),
        ],
        out_specs=pl.BlockSpec((bm, bf), lambda i, j: (i, j)),
        compiler_params=pltpu.CompilerParams(
            dimension_semantics=("parallel", "parallel"),
            vmem_limit_bytes=_vmem_limit(bm, bf, itemsize, n_streams=3),
        ),
    )(scale, x2d, y2d)

    return out.reshape(orig_shape)


class DropPath:
    """Drop paths (Stochastic Depth) per sample, as used in the ViT Block."""

    def __init__(self, drop_prob=None):
        self.drop_prob = drop_prob if drop_prob is not None else 0.0
        self.training = True  # mimic torch default training mode

    def __call__(self, x, key=None):
        return drop_path(x, self.drop_prob, self.training, key=key)


# ------------------------------------------------------------------ main ----

if __name__ == "__main__":
    key = jax.random.PRNGKey(0)
    k_x, k_mask, k_tok, k_branch, k_mask2, k_odd, k_mask3 = jax.random.split(key, 7)

    # --- standalone drop_path on an NCHW tensor (B=2, C=4, H=W=16) ----------
    x = jax.random.normal(k_x, (2, 4, 16, 16), dtype=jnp.float32)
    mod = DropPath(drop_prob=0.5)
    y_train = mod(x, key=k_mask)
    jax.block_until_ready(y_train)

    # reference: per-sample output is either 0 or x / keep_prob
    scale_ref = _per_sample_scale(k_mask, 2, 1.0 - 0.5)
    y_ref = x * scale_ref.reshape(2, 1, 1, 1)
    assert jnp.allclose(y_train, y_ref, atol=1e-6), "drop_path mismatch vs reference"

    # eval path is identity
    mod.training = False
    y_eval = mod(x)
    jax.block_until_ready(y_eval)
    assert jnp.array_equal(y_eval, x)

    # --- fused residual + drop_path on ViT tokens (B=2, N=8, C=32) ----------
    x_tok = jax.random.normal(k_tok, (2, 8, 32), dtype=jnp.float32)
    branch = jax.random.normal(k_branch, (2, 8, 32), dtype=jnp.float32)
    y_fused = residual_add_drop_path(x_tok, branch, drop_prob=0.3,
                                     training=True, key=k_mask2)
    jax.block_until_ready(y_fused)

    scale2 = _per_sample_scale(k_mask2, 2, 1.0 - 0.3)
    y_fused_ref = x_tok + branch * scale2.reshape(2, 1, 1)
    assert jnp.allclose(y_fused, y_fused_ref, atol=1e-5), "fused residual mismatch"

    # eval path of the fused op is a plain add (no kernel launch)
    y_fused_eval = residual_add_drop_path(x_tok, branch, drop_prob=0.3, training=False)
    jax.block_until_ready(y_fused_eval)
    assert jnp.allclose(y_fused_eval, x_tok + branch, atol=1e-6)

    # --- odd shapes: feat not a multiple of 128, B not a multiple of 8 ------
    x_odd = jax.random.normal(k_odd, (3, 5, 13), dtype=jnp.float32)
    y_odd = drop_path(x_odd, drop_prob=0.5, training=True, key=k_mask3)
    jax.block_until_ready(y_odd)
    scale3 = _per_sample_scale(k_mask3, 3, 0.5)
    assert jnp.allclose(y_odd, x_odd * scale3.reshape(3, 1, 1), atol=1e-6), \
        "odd-shape drop_path mismatch"

    print("KERNEL_OK")
</pallas_src>

<mosaic_0001>
module attributes {stable_mosaic.version = 11 : i64} {
  func.func @_drop_path_kernel(%arg0: i32, %arg1: i32, %arg2: memref<2x1xf32, #tpu.memory_space<vmem>>, %arg3: memref<2x128xf32, #tpu.memory_space<vmem>>, %arg4: memref<2x128xf32, #tpu.memory_space<vmem>>) attributes {dimension_semantics = [#tpu.dimension_semantics<parallel>, #tpu.dimension_semantics<parallel>], iteration_bounds = array<i64: 1, 8>, scalar_prefetch = 0 : i64, scratch_operands = 0 : i64, tpu.core_type = #tpu.core_type<tc>, window_params = [{transform_indices = @transform_0, window_bounds = array<i64: 2, 1>}, {transform_indices = @transform_1, window_bounds = array<i64: 2, 128>}, {transform_indices = @transform_2, window_bounds = array<i64: 2, 128>}]} {
    %c0 = arith.constant 0 : index
    %c0_0 = arith.constant 0 : index
    %0 = vector.load %arg2[%c0, %c0_0] : memref<2x1xf32, #tpu.memory_space<vmem>>, vector<2x1xf32>
    %c0_1 = arith.constant 0 : index
    %c0_2 = arith.constant 0 : index
    %1 = vector.load %arg3[%c0_1, %c0_2] : memref<2x128xf32, #tpu.memory_space<vmem>>, vector<2x128xf32>
    %2 = vector.broadcast %0 : vector<2x1xf32> to vector<2x128xf32>
    %3 = arith.mulf %1, %2 : vector<2x128xf32>
    %c0_3 = arith.constant 0 : index
    %c0_4 = arith.constant 0 : index
    %4 = vector.load %arg4[%c0_3, %c0_4] : memref<2x128xf32, #tpu.memory_space<vmem>>, vector<2x128xf32>
    tpu.vector_store %arg4[%c0_3, %c0_4], %3 {strides = array<i32>} : memref<2x128xf32, #tpu.memory_space<vmem>>, vector<2x128xf32>,
    return
  }
  func.func @transform_0(%arg0: i32, %arg1: i32) -> (i32, i32) {
    %c0_i32 = arith.constant 0 : i32
    %c0_i32_0 = arith.constant 0 : i32
    return %arg0, %c0_i32 : i32, i32
  }
  func.func @transform_1(%arg0: i32, %arg1: i32) -> (i32, i32) {
    %c0_i32 = arith.constant 0 : i32
    return %arg0, %arg1 : i32, i32
  }
  func.func @transform_2(%arg0: i32, %arg1: i32) -> (i32, i32) {
    %c0_i32 = arith.constant 0 : i32
    return %arg0, %arg1 : i32, i32
  }
}

</mosaic_0001>

<bundles_post_ra>
// kernel: tpu_custom_call.1
= control target key start
LH: loop header
LB: loop body
LE: loop exit
PB: predicated region body
PF: predicated region fallthrough
CT: control target
= control target key end

     0   :  { %7 = vsyncpa [#allocation3], 0  ;;  %s657_s0 = inlined_call_operand.vmem [shape: f32[2,1], index: 0, kind: input, shape index: {}]   ;;  %s658_s1 = inlined_call_operand.hbm [shape: f32[2,1024], index: 1, kind: input, shape index: {}]   ;;  %s659_s2 = inlined_call_operand.hbm [shape: f32[2,1024], index: 2, kind: output, shape index: {}]  }
   0x1   :  { %9 = vsyncpa [#allocation3 + $0x1], 0 }
   0x2   :  { %10 = vsyncpa [#allocation4], 0 }
   0x3   :  { %12 = vsyncpa [#allocation4 + $0x1], 0  ;;  %s522_s9 = smov 0   ;;  %s524_s10 = smov 0  }
   0x4   :  { %s526_s11 = smov 0   ;;  %s528_s12 = smov 0  }
   0x5   :  { %s530_s13 = smov 0   ;;  %s532_s14 = smov 0  }
   0x6 LB: > { %s316_s15 = sadd.s32 4294967295, %s502_s14   ;;  %s317_s16 = sadd.s32 4294967294, %s502_s14   ;;  %s502_s14 = sphi %s532_s14, %s18_s14   ;;  %s498_s13 = sphi %s530_s13, %s670_s13   ;;  %s494_s12 = sphi %s528_s12, %s669_s12   ;;  %s490_s11 = sphi %s526_s11, %s668_s11   ;;  %s486_s10 = sphi %s524_s10, %s667_s10   ;;  %s482_s9 = sphi %s522_s9, %s666_s9  }
   0x7   : > { %s27_s17 = sadd.s32 1, %s498_s13  ;;  %s65_s18 = sadd.s32 1, %s490_s11 }
   0x8   : > { %p28_p0 = scmp.ge.s32.totalorder %s27_s17, 8  ;;  %p72_p1 = scmp.ne.s32.totalorder %s490_s11, %s486_s10 }
   0x9   : > { %p73_p2 = scmp.eq.s32.totalorder %s502_s14, 0  ;;  %p78_p3 = scmp.ne.s32.totalorder %s486_s10, %s482_s9 }
   0xa   : > { %s672_s17 = smov (%p28_p0, %s27_s17), 0  ;;  %p79_p5 = scmp.eq.s32.totalorder %s316_s15, 0 }
   0xb   : > { %p563_p4 = por %p73_p2, %p72_p1  ;;  %s61_s20 = ssub.s32 %s498_s13, %s672_s17 }
   0xc   : > { %p104_p6 = scmp.eq.s32.totalorder %s316_s15, 7  ;;  %p63_p7 = scmp.eq.s32.totalorder %s61_s20, 0 }
   0xd   : > { %p569_p8 = por %p79_p5, %p78_p3  ;;  %p110_p10 = scmp.eq.s32.totalorder %s317_s16, 7 }
   0xe   : > { %p573_p9 = por %p104_p6, %p72_p1  ;;  %p342_p12 = scmp.lt.s32.totalorder %s502_s14, 8 }
   0xf   : > { %s578_s23 = scalar_select %p63_p7, %s490_s11, %s65_s18  }
  0x10   : > { %p580_p11 = por %p110_p10, %p78_p3  ;;  %s137_s25 = sand.u32 1, %s490_s11  }
  0x11   : > { %s321_s26 = sshll.u32 %s137_s25, 1  ;;  %s322_s27 = sshll.u32 %s498_s13, 5 }
  0x12   : > { %s663_s24 = scalar_select %p580_p11, 1, 0 }
  0x13   : > { %s148_s30 = scalar_lea.hbm %s658_s1, %s322_s27  ;;  %s141_s3 = scalar_lea.vmem [#allocation2], %s321_s26 }
  0x14   : > { %s150_s4 = sshll.u32 %s141_s3, 4  ;;  %p592_p13 = pnand %p342_p12, %p563_p4  ;;  %s151_s4 = int_to_ptr.vmem [resolvable:$true] %s150_s4 }
  0x15   : > { %p323_p0 = scmp.ge.s32.totalorder %s502_s14, 1  ;;  %p155_p1 = scmp.lt.s32.totalorder %s502_s14, 9 }
  0x16   : > { %s138_s6 = scalar_lea.sflag [#allocation3], %s137_s25  ;;  %p396_p2 = pneg %p592_p13 }
  0x17   : > { %s407_s7 = scalar_lea.vmem %s151_s4, 32  ;;  %s504_s8 = smov [#allocation2]  }
  0x18   : > { %p408_p3 = scmp.ne.s32.totalorder %s151_s4, %s407_s7  ;;  %s412_s15 = sshll.u32 %s504_s8, 4  ;;  %s413_s15 = int_to_ptr.vmem [resolvable:$false] %s412_s15 }
  0x19   : > { %s414_s16 = scalar_lea.vmem %s413_s15, 64  ;;  %p415_p7 = scmp.lt.s32.totalorder %s151_s4, %s413_s15 }
  0x1a   : > { %p410_p5 = pnand %p408_p3, %p396_p2  ;;  %p416_p10 = scmp.lt.s32.totalorder %s414_s16, %s407_s7 }
  0x1c   : > { %p411_p6 = pneg %p410_p5  ;;  %p417_p4 = por %p416_p10, %p415_p7 }
  0x1e   : > { %p418_p12 = pnand %p417_p4, %p411_p6 }
  0x20   : > { %421 = shalt.err (!%p418_p12)
}
  0x21   : > { %337 = dma.hbm_to_vmem [thread:$0]  (!%p592_p13), %s148_s30, 32, %s151_s4, %s138_s6  }
  0x22   : > { %p156_p11 = pnand %p323_p0, %p155_p1 }
  0x23   : > { %s607_s18 = sand.u32 (!%p156_p11), 1, %s486_s10  }
  0x24   : > { %159 = sbr.rel (%p156_p11) target bundleno = 183 (0xb7), region = 28  ;;  %s324_s19 = sshll.u32 (!%p156_p11), %s607_s18, 1 }
  0x25   : > { %s162_s20 = scalar_lea.sflag (!%p156_p11), [#allocation3], %s607_s18  ;;  %s165_s25 = scalar_lea.vmem (!%p156_p11), [#allocation2], %s324_s19 }
  0x29   : > { %473 = dma.done.wait (%p569_p8), %s162_s20, 32  }
  0x2a   : > { %475 = vsyncadd (%p569_p8), %s162_s20, 4294967264  ;;  %v505_v0 = vmov 0   ;;  %v194_v1 = vld [vmem:[%s657_s0] sm:$0x3]  ;;  %s327_s28 = sshll.u32 %s494_s12, 5  ;;  %s189_s29 = scalar_lea.vmem [#allocation5], %s324_s19 }
  0x2b   : > { %393 = vset.pattern.permute.xlu0 %v505_v0  ;;  %v195_v2 = vld [vmem:[%s165_s25] sm:$0x3]  ;;  %s219_s30 = sshll.u32 %s189_s29, 4  ;;  %s217_s21 = scalar_lea.hbm %s659_s2, %s327_s28  ;;  %s220_s30 = int_to_ptr.vmem [resolvable:$true] %s219_s30 }
  0x2c   : > { %198 = vperm.xlu0 %393, %v194_v1   ;;  %s204_s5 = scalar_lea.sflag [#allocation4], %s607_s18  ;;  %s422_s6 = scalar_lea.vmem %s220_s30, 32 }
  0x2d   : > { %p423_p8 = scmp.ne.s32.totalorder %s220_s30, %s422_s6  ;;  %s506_s7 = smov [#allocation5]  }
  0x2e   : > { %s426_s8 = sshll.u32 %s506_s7, 4  ;;  %s427_s8 = int_to_ptr.vmem [resolvable:$false] %s426_s8 }
  0x2f   : > { %p424_p11 = pnand %p423_p8, %p573_p9  ;;  %s428_s12 = scalar_lea.vmem %s427_s8, 64 }
  0x30   : > { %p429_p0 = scmp.lt.s32.totalorder %s220_s30, %s427_s8  ;;  %p430_p1 = scmp.lt.s32.totalorder %s428_s12, %s422_s6 }
  0x31   : > { %p425_p13 = pneg %p424_p11 }
  0x32   : > { %p431_p2 = por %p430_p1, %p429_p0 }
  0x34   : > { %p432_p3 = pnand %p431_p2, %p425_p13 }
  0xa7   : > { %v199_v3 = vpop.permute.xlu0 %198 }
  0xa8   : > { %v201_v4 = vmul.f32 %v199_v3, %v195_v2 }
  0xaa   : > { %202 = vst [vmem:[%s189_s29] sm:$0x3] %v201_v4 }
  0xab   : > { %435 = shalt.err (!%p432_p3)
}
  0xac   : > { %s436_s15 = scalar_lea.hbm %s217_s21, 32  ;;  %s440_s19 = scalar_lea.hbm %s659_s2, 256 }
  0xad   : > { %p437_p5 = scmp.ne.s32.totalorder %s217_s21, %s436_s15  ;;  %p441_p10 = scmp.lt.s32.totalorder %s217_s21, %s659_s2 }
  0xae   : > { %p442_p4 = scmp.lt.s32.totalorder %s440_s19, %s436_s15 }
  0xaf   : > { %p438_p6 = pnand %p437_p5, %p573_p9 }
  0xb0   : > { %p443_p12 = por %p442_p4, %p441_p10 }
  0xb1   : > { %p439_p7 = pneg %p438_p6 }
  0xb3   : > { %p444_p8 = pnand %p443_p12, %p439_p7 }
  0xb5   : > { %447 = shalt.err (!%p444_p8)
}
  0xb6   : > { %332 = dma.vmem_to_hbm [thread:$0]  (%p573_p9), %s220_s30, 32, %s217_s21, %s204_s5  }
  0xb7 PF: > { %p343_p11 = scmp.ge.s32.totalorder %s502_s14, 2  ;;  %s231_s26 = sand.u32 1, %s482_s9  }
  0xb8   : > { %p665_p13 = scmp.ne.s32.totalorder %s663_s24, 0  ;;  %s232_s27 = scalar_lea.sflag [#allocation4], %s231_s26 }
  0xba   : > { %p339_p0 = pnand %p343_p11, %p665_p13 }
  0xbc   : > { %p340_p1 = pneg %p339_p0 }
  0xbe   : > { %477 = dma.done.wait (%p340_p1), %s232_s27, 32  }
  0xbf   : > { %479 = vsyncadd (%p340_p1), %s232_s27, 4294967264  ;;  %s18_s14 = sadd.s32 1, %s502_s14   ;;  %s666_s9 = smov %s486_s10 }
  0xc0   : > { %p15_p2 = scmp.ge.s32.totalorder %s18_s14, 10   ;;  %s667_s10 = smov %s490_s11 }
  0xc1   : > { %s668_s11 = smov %s578_s23  ;;  %s669_s12 = smov %s498_s13 }
  0xc2   : > { %s670_s13 = smov %s672_s17  ;;  %17 = sbr.rel (!%p15_p2) target bundleno = 6 (0x6), region = 76 }
  0xc7   :  { %237 = vsyncpa [#allocation3], 1 }
  0xc8   :  { %239 = vsyncpa [#allocation3 + $0x1], 1 }
  0xc9   :  { %240 = vsyncpa [#allocation4], 1 }
  0xca   :  { %242 = vsyncpa [#allocation4 + $0x1], 1 }

</bundles_post_ra>
